<compile_context>
chip_gen: v6e
topology: v6e:2x2x1
jax: 0.10.0
libtpu: 0.0.40
codegen_flags: <defaults>
</compile_context>

<pallas_src>
import math

import jax
import jax.numpy as jnp
from jax.experimental import pallas as pl
from jax.experimental.pallas import tpu as pltpu

_TWO_PI = 2.0 * math.pi


def _fourier_kernel(geff_ref, bias_ref, xyz_ref, out_ref):
    # geff_ref: (1, d_out, d_in)  per-batch folded weights (scale & 2*pi baked in)
    # bias_ref: (1, d_out, 1)     per-batch folded bias  (-(shift*scale*2*pi) @ G)
    # xyz_ref:  (1, d_in, TN)     channels-first coords, N on lanes
    # out_ref:  (1, 2*d_out, TN)  [sin | cos] stacked on sublanes, N on lanes
    g = geff_ref[0]                        # (d_out, d_in)
    b = bias_ref[0]                        # (d_out, 1)
    x = xyz_ref[0]                         # (d_in, TN)
    d_out, d_in = g.shape

    # K = d_in (=3) is far too small for the MXU: do it as d_in VPU FMAs that
    # hide under the sin/cos polynomial cost.
    proj = b                               # (d_out, 1) -> broadcast over lanes
    for c in range(d_in):                  # static unroll (d_in is tiny)
        proj = proj + g[:, c:c + 1] * x[c:c + 1, :]   # (d_out, TN)

    # Direct slice stores (no concatenate temporary), lane-dense along N.
    # TODO(synk): on v7x (HBM 3.2 TB/s) the VPU sin/cos polynomials may become
    # the binding slot; a fused sincos sharing one range reduction would cut
    # that -- verify with a bundle dump before changing.
    out_ref[0, :d_out, :] = jnp.sin(proj).astype(out_ref.dtype)
    out_ref[0, d_out:, :] = jnp.cos(proj).astype(out_ref.dtype)


def position_embedding_fourier(xyz, gauss_B, num_channels=None,
                               input_range=None, normalize=False,
                               tile_n=8192, out_dtype=jnp.float32):
    """JAX/Pallas equivalent of PositionEmbeddingCoordsSine.forward ('fourier').

    Returns (B, num_channels, N), channels-first, matching the PyTorch module's
    `.permute(0, 2, 1)` output.  Set out_dtype=jnp.bfloat16 when the consumer
    tolerates it (halves the dominant output HBM stream).
    """
    B, N, d_in = xyz.shape
    if num_channels is None:
        num_channels = gauss_B.shape[1] * 2
    assert num_channels > 0 and num_channels % 2 == 0
    d_out = num_channels // 2
    assert d_out <= gauss_B.shape[1]
    assert d_in == gauss_B.shape[0]
    assert tile_n % 128 == 0, "tile_n must be a multiple of 128 (lane width)"

    gb = gauss_B[:, :d_out].astype(jnp.float32)              # (d_in, d_out)

    if normalize:
        # shift_scale_points with default dst_range=[0,1]:
        #   prop = (xyz - src_min) / (src_max - src_min)
        src_min, src_max = input_range                       # each (B, d_in)
        diff = (src_max - src_min).astype(jnp.float32)
        # Guard degenerate ranges (PyTorch would produce inf/nan here).
        diff = jnp.where(diff == 0.0, 1.0, diff)
        shift = src_min.astype(jnp.float32)
        scale = 1.0 / diff
    else:
        shift = jnp.zeros((B, d_in), jnp.float32)
        scale = jnp.ones((B, d_in), jnp.float32)

    # Fold shift/scale/2*pi into per-batch effective weights + bias:
    #   ((x - shift) * scale * 2*pi) @ G  ==  x @ W_b + bias_b
    w = (scale * _TWO_PI)[:, :, None] * gb[None, :, :]       # (B, d_in, d_out)
    bias = -jnp.einsum("bd,bde->be", shift, w)               # (B, d_out)
    geff = jnp.transpose(w, (0, 2, 1))                       # (B, d_out, d_in)
    bias = bias[:, :, None]                                  # (B, d_out, 1)

    # Channels-first coords (small XLA transpose, ~24 B/point extra HBM).
    # TODO(synk): folding this into the kernel needs either an in-kernel
    # (TN,3)->(3,TN) relayout (XLU transpose of mostly-padded 128x128 blocks)
    # or a (TN,3) VMEM block that gets lane-padded to 128 wide; both looked
    # worse than the XLA transpose on paper -- revisit with a bundle dump.
    xyz_t = jnp.transpose(xyz.astype(jnp.float32), (0, 2, 1))  # (B, d_in, N)

    # Tile N; the (possibly ragged) last tile is handled by Pallas via padded
    # reads + masked writeback, so no input pad and no output slice is needed.
    tn = N if N <= tile_n else tile_n
    n_tiles = pl.cdiv(N, tn)

    return pl.pallas_call(
        _fourier_kernel,
        out_shape=jax.ShapeDtypeStruct((B, 2 * d_out, N), out_dtype),
        grid_spec=pltpu.PrefetchScalarGridSpec(
            num_scalar_prefetch=0,
            grid=(B, n_tiles),
            in_specs=[
                pl.BlockSpec((1, d_out, d_in), lambda b, n: (b, 0, 0)),  # geff
                pl.BlockSpec((1, d_out, 1), lambda b, n: (b, 0, 0)),     # bias
                pl.BlockSpec((1, d_in, tn), lambda b, n: (b, 0, n)),     # xyz
            ],
            out_specs=pl.BlockSpec((1, 2 * d_out, tn), lambda b, n: (b, 0, n)),
        ),
        compiler_params=pltpu.CompilerParams(
            dimension_semantics=("parallel", "parallel")),
    )(geff, bias, xyz_t)


# TODO(synk): the 'sine' pos_type branch (per-coordinate temperature
# embeddings) is not implemented here; only the default/fourier path.


def _reference_fourier(xyz, gauss_B, num_channels, input_range, normalize):
    """Plain-JAX reference mirroring the PyTorch get_fourier_embeddings."""
    x = xyz.astype(jnp.float32)
    if normalize:
        smin, smax = input_range
        x = (x - smin[:, None, :]) / (smax - smin)[:, None, :]
    x = x * _TWO_PI
    d_out = num_channels // 2
    proj = jnp.einsum("bnd,de->bne", x, gauss_B[:, :d_out].astype(jnp.float32))
    emb = jnp.concatenate([jnp.sin(proj), jnp.cos(proj)], axis=-1)
    return jnp.transpose(emb, (0, 2, 1))


if __name__ == "__main__":
    # Module hyperparameters (deterministic, in-script "weights").
    d_in = 3
    d_pos = 32            # num_channels
    gauss_scale = 1.0
    normalize = True

    key = jax.random.PRNGKey(0)
    k_gauss, k_xyz, k_xyz2 = jax.random.split(key, 3)

    # gauss_B ~ Normal(0,1) * gauss_scale, shape (d_in, d_pos // 2)
    gauss_B = jax.random.normal(k_gauss, (d_in, d_pos // 2), jnp.float32) * gauss_scale

    # --- small shape (single N tile, full-dim block) ---
    B, N = 2, 8
    xyz = jax.random.uniform(k_xyz, (B, N, d_in), jnp.float32, minval=-2.0, maxval=3.0)
    input_range = (jnp.min(xyz, axis=1), jnp.max(xyz, axis=1))

    out = position_embedding_fourier(xyz, gauss_B, num_channels=d_pos,
                                     input_range=input_range, normalize=normalize)
    out = jax.block_until_ready(out)
    ref = _reference_fourier(xyz, gauss_B, d_pos, input_range, normalize)
    assert out.shape == (B, d_pos, N), out.shape
    # Folded weights/bias differ from the unfolded reference only by fp rounding.
    assert jnp.allclose(out, ref, rtol=1e-4, atol=1e-4), "mismatch vs reference (small)"

    # --- larger N to exercise the ragged-last-tile path (tile_n=128, no pad/slice) ---
    B2, N2 = 2, 200
    xyz2 = jax.random.uniform(k_xyz2, (B2, N2, d_in), jnp.float32, minval=-1.0, maxval=4.0)
    input_range2 = (jnp.min(xyz2, axis=1), jnp.max(xyz2, axis=1))
    out2 = position_embedding_fourier(xyz2, gauss_B, num_channels=d_pos,
                                      input_range=input_range2, normalize=normalize,
                                      tile_n=128)
    out2 = jax.block_until_ready(out2)
    ref2 = _reference_fourier(xyz2, gauss_B, d_pos, input_range2, normalize)
    assert out2.shape == (B2, d_pos, N2), out2.shape
    assert jnp.allclose(out2, ref2, rtol=1e-4, atol=1e-4), "mismatch vs reference (tiled)"

    # --- bf16 output path (halves the dominant HBM write stream) ---
    out3 = position_embedding_fourier(xyz2, gauss_B, num_channels=d_pos,
                                      input_range=input_range2, normalize=normalize,
                                      tile_n=128, out_dtype=jnp.bfloat16)
    out3 = jax.block_until_ready(out3)
    assert out3.dtype == jnp.bfloat16
    assert jnp.allclose(out3.astype(jnp.float32), ref2, rtol=3e-2, atol=3e-2), \
        "mismatch vs reference (bf16)"

    print("KERNEL_OK")
</pallas_src>

<mosaic_0001>
module attributes {stable_mosaic.version = 11 : i64} {
  func.func @_fourier_kernel(%arg0: i32, %arg1: i32, %arg2: memref<1x16x3xf32, #tpu.memory_space<vmem>>, %arg3: memref<1x16x1xf32, #tpu.memory_space<vmem>>, %arg4: memref<1x3x8xf32, #tpu.memory_space<vmem>>, %arg5: memref<1x32x8xf32, #tpu.memory_space<vmem>>) attributes {dimension_semantics = [#tpu.dimension_semantics<parallel>, #tpu.dimension_semantics<parallel>], iteration_bounds = array<i64: 2, 1>, scalar_prefetch = 0 : i64, scratch_operands = 0 : i64, tpu.core_type = #tpu.core_type<tc>, window_params = [{transform_indices = @transform_0, window_bounds = array<i64: 1, 16, 3>}, {transform_indices = @transform_1, window_bounds = array<i64: 1, 16, 1>}, {transform_indices = @transform_2, window_bounds = array<i64: 1, 3, 8>}, {transform_indices = @transform_3, window_bounds = array<i64: 1, 32, 8>}]} {
    %c0 = arith.constant 0 : index
    %c0_0 = arith.constant 0 : index
    %c0_1 = arith.constant 0 : index
    %0 = vector.load %arg2[%c0, %c0_0, %c0_1] : memref<1x16x3xf32, #tpu.memory_space<vmem>>, vector<1x16x3xf32>
    %1 = vector.shape_cast %0 : vector<1x16x3xf32> to vector<16x3xf32>
    %c0_2 = arith.constant 0 : index
    %c0_3 = arith.constant 0 : index
    %c0_4 = arith.constant 0 : index
    %2 = vector.load %arg3[%c0_2, %c0_3, %c0_4] : memref<1x16x1xf32, #tpu.memory_space<vmem>>, vector<1x16x1xf32>
    %3 = vector.shape_cast %2 : vector<1x16x1xf32> to vector<16x1xf32>
    %c0_5 = arith.constant 0 : index
    %c0_6 = arith.constant 0 : index
    %c0_7 = arith.constant 0 : index
    %4 = vector.load %arg4[%c0_5, %c0_6, %c0_7] : memref<1x3x8xf32, #tpu.memory_space<vmem>>, vector<1x3x8xf32>
    %5 = vector.shape_cast %4 : vector<1x3x8xf32> to vector<3x8xf32>
    %6 = vector.extract_strided_slice %1 {offsets = [0, 0], sizes = [16, 1], strides = [1, 1]} : vector<16x3xf32> to vector<16x1xf32>
    %7 = vector.extract_strided_slice %5 {offsets = [0, 0], sizes = [1, 8], strides = [1, 1]} : vector<3x8xf32> to vector<1x8xf32>
    %8 = vector.broadcast %6 : vector<16x1xf32> to vector<16x8xf32>
    %9 = vector.broadcast %7 : vector<1x8xf32> to vector<16x8xf32>
    %10 = arith.mulf %8, %9 : vector<16x8xf32>
    %11 = vector.broadcast %3 : vector<16x1xf32> to vector<16x8xf32>
    %12 = arith.addf %11, %10 : vector<16x8xf32>
    %13 = vector.extract_strided_slice %1 {offsets = [0, 1], sizes = [16, 1], strides = [1, 1]} : vector<16x3xf32> to vector<16x1xf32>
    %14 = vector.extract_strided_slice %5 {offsets = [1, 0], sizes = [1, 8], strides = [1, 1]} : vector<3x8xf32> to vector<1x8xf32>
    %15 = vector.broadcast %13 : vector<16x1xf32> to vector<16x8xf32>
    %16 = vector.broadcast %14 : vector<1x8xf32> to vector<16x8xf32>
    %17 = arith.mulf %15, %16 : vector<16x8xf32>
    %18 = arith.addf %12, %17 : vector<16x8xf32>
    %19 = vector.extract_strided_slice %1 {offsets = [0, 2], sizes = [16, 1], strides = [1, 1]} : vector<16x3xf32> to vector<16x1xf32>
    %20 = vector.extract_strided_slice %5 {offsets = [2, 0], sizes = [1, 8], strides = [1, 1]} : vector<3x8xf32> to vector<1x8xf32>
    %21 = vector.broadcast %19 : vector<16x1xf32> to vector<16x8xf32>
    %22 = vector.broadcast %20 : vector<1x8xf32> to vector<16x8xf32>
    %23 = arith.mulf %21, %22 : vector<16x8xf32>
    %24 = arith.addf %18, %23 : vector<16x8xf32>
    %25 = math.sin %24 : vector<16x8xf32>
    %c0_8 = arith.constant 0 : index
    %c0_9 = arith.constant 0 : index
    %c0_10 = arith.constant 0 : index
    %26 = vector.load %arg5[%c0_8, %c0_9, %c0_10] : memref<1x32x8xf32, #tpu.memory_space<vmem>>, vector<1x16x8xf32>
    %27 = vector.shape_cast %26 : vector<1x16x8xf32> to vector<16x8xf32>
    %28 = vector.shape_cast %25 : vector<16x8xf32> to vector<1x16x8xf32>
    tpu.vector_store %arg5[%c0_8, %c0_9, %c0_10], %28 {strides = array<i32>} : memref<1x32x8xf32, #tpu.memory_space<vmem>>, vector<1x16x8xf32>,
    %29 = math.cos %24 : vector<16x8xf32>
    %c0_11 = arith.constant 0 : index
    %c16 = arith.constant 16 : index
    %c0_12 = arith.constant 0 : index
    %30 = vector.load %arg5[%c0_11, %c16, %c0_12] : memref<1x32x8xf32, #tpu.memory_space<vmem>>, vector<1x16x8xf32>
    %31 = vector.shape_cast %30 : vector<1x16x8xf32> to vector<16x8xf32>
    %32 = vector.shape_cast %29 : vector<16x8xf32> to vector<1x16x8xf32>
    tpu.vector_store %arg5[%c0_11, %c16, %c0_12], %32 {strides = array<i32>} : memref<1x32x8xf32, #tpu.memory_space<vmem>>, vector<1x16x8xf32>,
    return
  }
  func.func @transform_0(%arg0: i32, %arg1: i32) -> (i32, i32, i32) {
    %c0_i32 = arith.constant 0 : i32
    %c0_i32_0 = arith.constant 0 : i32
    %c0_i32_1 = arith.constant 0 : i32
    return %arg0, %c0_i32, %c0_i32_0 : i32, i32, i32
  }
  func.func @transform_1(%arg0: i32, %arg1: i32) -> (i32, i32, i32) {
    %c0_i32 = arith.constant 0 : i32
    %c0_i32_0 = arith.constant 0 : i32
    %c0_i32_1 = arith.constant 0 : i32
    return %arg0, %c0_i32, %c0_i32_0 : i32, i32, i32
  }
  func.func @transform_2(%arg0: i32, %arg1: i32) -> (i32, i32, i32) {
    %c0_i32 = arith.constant 0 : i32
    %c0_i32_0 = arith.constant 0 : i32
    return %arg0, %c0_i32, %arg1 : i32, i32, i32
  }
  func.func @transform_3(%arg0: i32, %arg1: i32) -> (i32, i32, i32) {
    %c0_i32 = arith.constant 0 : i32
    %c0_i32_0 = arith.constant 0 : i32
    return %arg0, %c0_i32, %arg1 : i32, i32, i32
  }
}

</mosaic_0001>

<bundles_post_ra>
// kernel: tpu_custom_call.1
= control target key start
LH: loop header
LB: loop body
LE: loop exit
PB: predicated region body
PF: predicated region fallthrough
CT: control target
= control target key end

     0   :  { %s968_s12 = smov 0   ;;  %s970_s13 = smov 0   ;;  %s1084_s0 = inlined_call_operand.vmem [shape: f32[2,16,3], index: 0, kind: input, shape index: {}]   ;;  %s1085_s1 = inlined_call_operand.vmem [shape: f32[2,16,1], index: 1, kind: input, shape index: {}]   ;;  %s1086_s2 = inlined_call_operand.vmem [shape: f32[2,3,8], index: 2, kind: input, shape index: {}]   ;;  %s1087_s3 = inlined_call_operand.vmem [shape: f32[2,32,8], index: 3, kind: output, shape index: {}]  }
   0x1   :  { %s972_s14 = smov 0  }
   0x2 LB: > { %s25_s15 = sadd.s32 1, %s933_s13  ;;  %p831_p0 = scmp.ge.s32.totalorder %s937_s14, 1  ;;  %s937_s14 = sphi %s972_s14, %s13_s14   ;;  %s933_s13 = sphi %s970_s13, %s1089_s13   ;;  %s929_s12 = sphi %s968_s12, %s1088_s12  }
   0x3   : > { %p27_p1 = scmp.ge.s32.totalorder %s25_s15, 2  ;;  %p175_p2 = scmp.lt.s32.totalorder %s937_s14, 3 }
   0x5   : > { %s1091_s15 = smov (%p27_p1, %s25_s15), 0  ;;  %p176_p3 = pnand %p831_p0, %p175_p2 }
   0x6   : > { %p214_p4 = scmp.lt.s32.totalorder (!%p176_p3), %s929_s12, 1 }
   0x7   : > { %179 = sbr.rel (%p176_p3) target bundleno = 251 (0xfb), region = 32 }
   0xc   : > { %v939_v0 = vmov 0   ;;  %s1093_s12 = smov (!%p214_p4, %s929_s12), 1  ;;  %v940_v5 = vmov 1   ;;  %v941_v6 = vmov 2   ;;  %v254_v7 = vlaneseq }
   0xd   : > { %902 = vset.pattern.permute.xlu1 %v939_v0  ;;  %901 = vset.pattern.permute.xlu0 %v939_v0  ;;  %s857_s16 = sshll.u32 %s1093_s12, 4  ;;  %s836_s23 = sshll.u32 %s1093_s12, 2  ;;  %v942_v56 = vmov 683565275   ;;  %v943_v60 = vmov 2475754826  }
   0xe   : > { %s223_s19 = scalar_lea.vmem %s1085_s1, %s857_s16  ;;  %s218_s22 = scalar_lea.vmem %s1084_s0, %s857_s16  ;;  %v255_v8 = vshrl.u32 %v254_v7, 7  ;;  %v944_v62 = vmov 2131351028   ;;  %v945_v0 = vmov 2102212464  }
   0xf   : > { %v241_v1 = vld [vmem:[%s223_s19] sm:$0xff]  ;;  %v242_v3 = vld [vmem:[%s223_s19 + $0x8] sm:$0xff]  ;;  %s230_s26 = scalar_lea.vmem %s1086_s2, %s836_s23  ;;  %s859_s27 = sshll.u32 %s1093_s12, 5 }
  0x10   : > { %262 = vperm.xlu1 %902, %v241_v1   ;;  %v239_v2 = vld [vmem:[%s218_s22] sm:$0xff]  ;;  %v240_v4 = vld [vmem:[%s218_s22 + $0x8] sm:$0xff]  ;;  %v256_v10 = vsub.s32 0, %v255_v8  ;;  %v282_v13 = vsub.s32 1, %v255_v8  ;;  %v298_v18 = vsub.s32 2, %v255_v8  ;;  %s1063_s30 = scalar_lea.vmem %s1087_s3, %s859_s27 }
  0x11   : > { %246 = vperm.xlu0 %901, %v239_v2   ;;  %v243_v12 = vld [vmem:[%s230_s26] sm:$0x7] }
  0x12   : > { %v257_v15 = vrot.slane %v243_v12, %v256_v10  ;;  %v283_v17 = vrot.slane %v243_v12, %v282_v13  ;;  %v299_v24 = vrot.slane %v243_v12, %v298_v18 }
  0x14   : > { %267 = vperm.xlu1 %902, %v242_v3  }
  0x15   : > { %251 = vperm.xlu0 %901, %v240_v4  }
  0x18   : > { %904 = vset.pattern.permute.xlu1 %v940_v5 }
  0x19   : > { %903 = vset.pattern.permute.xlu0 %v940_v5  ;;  %277 = vperm.xlu1 %904, %v240_v4  }
  0x1a   : > { %273 = vperm.xlu0 %903, %v239_v2  }
  0x1d   : > { %905 = vset.pattern.permute.xlu1 %v941_v6 }
  0x1e   : > { %906 = vset.pattern.permute.xlu0 %v941_v6  ;;  %289 = vperm.xlu1 %905, %v239_v2   ;;  %v946_v2 = vmov 920167782  }
  0x1f   : > { %293 = vperm.xlu0 %906, %v240_v4  }
  0x8b   : > { %v263_v9 = vpop.permute.xlu1 %262 }
  0x8c   : > { %v247_v11 = vpop.permute.xlu0 %246 }
  0x8d   : > { %v258_v19 = vmul.f32 %v257_v15, %v247_v11 }
  0x8f   : > { %v268_v14 = vpop.permute.xlu1 %267  ;;  %v270_v26 = vadd.f32 %v263_v9, %v258_v19  ;;  %v947_v9 = vmov 1326507024  }
  0x90   : > { %v252_v16 = vpop.permute.xlu0 %251 }
  0x91   : > { %v259_v21 = vmul.f32 %v257_v15, %v252_v16 }
  0x93   : > { %v271_v27 = vadd.f32 %v268_v14, %v259_v21 }
  0x94   : > { %v278_v20 = vpop.permute.xlu1 %277 }
  0x95   : > { %v274_v22 = vpop.permute.xlu0 %273  ;;  %v285_v25 = vmul.f32 %v283_v17, %v278_v20 }
  0x96   : > { %v284_v23 = vmul.f32 %v283_v17, %v274_v22 }
  0x97   : > { %v287_v32 = vadd.f32 %v285_v25, %v271_v27 }
  0x98   : > { %v286_v29 = vadd.f32 %v284_v23, %v270_v26 }
  0x99   : > { %v290_v28 = vpop.permute.xlu1 %289 }
  0x9a   : > { %v300_v30 = vmul.f32 %v299_v24, %v290_v28  ;;  %v294_v31 = vpop.permute.xlu0 %293 }
  0x9b   : > { %v301_v33 = vmul.f32 %v299_v24, %v294_v31 }
  0x9c   : > { %v999_v34 = vadd.f32 %v300_v30, %v286_v29 }
  0x9d   : > { %v1001_v35 = vadd.f32 %v301_v33, %v287_v32 }
  0x9e   : > { %v304_v36 = vand.u32 2147483647, %v999_v34  ;;  %v307_v37 = vand.u32 2139095040, %v999_v34  ;;  %vm306_vm14 = vcmp.lt.s32.totalorder %v999_v34, 0 }
  0x9f   : > { %v411_v38 = vand.u32 2139095040, %v1001_v35  ;;  %v408_v41 = vand.u32 2147483647, %v1001_v35 }
  0xa0   : > { %v308_v39 = vshrl.u32 %v307_v37, 23  ;;  %v311_v40 = vand.u32 8388607, %v304_v36  ;;  %vm305_vm15 = vcmp.le.f32.partialorder %v304_v36, 0.7853982 }
  0xa1   : > { %v412_v42 = vshrl.u32 %v411_v38, 23  ;;  %v1011_v47 = vand.u32 8388607, %v408_v41 }
  0xa2   : > { %v839_v43 = vadd.s32 4294967169, %v308_v39  ;;  %v312_v46 = vor.u32 8388608, %v311_v40 }
  0xa3   : > { %v843_v44 = vadd.s32 4294967169, %v412_v42  ;;  %v416_v54 = vor.u32 8388608, %v1011_v47 }
  0xa4   : > { %v314_v45 = vadd.s32 1, %v839_v43  ;;  %v1013_v53 = vshll.u32 %v312_v46, 8 }
  0xa5   : > { %v418_v48 = vadd.s32 1, %v843_v44 }
  0xa6   : > { %vm315_vm0 = vcmp.gt.s32.totalorder %v314_v45, 0 }
  0xa7   : > { %v316_v49 = vsel %vm315_vm0, %v314_v45, 0  ;;  %vm419_vm1 = vcmp.gt.s32.totalorder %v418_v48, 0  ;;  %vm410_vm0 = vcmp.lt.s32.totalorder %v1001_v35, 0 }
  0xa8   : > { %v317_v50 = vshrl.u32 %v316_v49, 5  ;;  %v318_v51 = vand.u32 31, %v316_v49  ;;  %v420_v52 = vsel %vm419_vm1, %v418_v48, 0  ;;  %v456_v48 = vshll.u32 %v416_v54, 8 }
  0xa9   : > { %v1016_v58 = vshrl.u32 %v420_v52, 5  ;;  %v422_v59 = vand.u32 31, %v420_v52  ;;  %vm409_vm1 = vcmp.le.f32.partialorder %v408_v41, 0.7853982 }
  0xaa   : > { %v319_v55 = vsub.s32 32, %v318_v51  ;;  %v321_v57 = vshll.u32 %v942_v56, %v318_v51  ;;  %v324_v61 = vshll.u32 %v943_v60, %v318_v51  ;;  %v327_v63 = vshll.u32 %v944_v62, %v318_v51 }
  0xab   : > { %v330_v1 = vshll.u32 %v945_v0, %v318_v51  ;;  %v333_v3 = vshll.u32 %v946_v2, %v318_v51  ;;  %vm336_vm2 = vcmp.lt.s32.totalorder %v317_v50, 1  ;;  %vm337_vm3 = vcmp.lt.s32.totalorder %v317_v50, 2 }
  0xac   : > { %v322_v4 = vshrl.u32 %v943_v60, %v319_v55  ;;  %v325_v5 = vshrl.u32 %v944_v62, %v319_v55  ;;  %v328_v6 = vshrl.u32 %v945_v0, %v319_v55  ;;  %v320_v7 = vshrl.u32 %v942_v56, %v319_v55 }
  0xad   : > { %v331_v8 = vshrl.u32 %v946_v2, %v319_v55  ;;  %v334_v10 = vshrl.u32 %v947_v9, %v319_v55  ;;  %v423_v14 = vsub.s32 32, %v422_v59  ;;  %vm338_vm4 = vcmp.lt.s32.totalorder %v317_v50, 3 }
  0xae   : > { %v323_v11 = vor.u32 %v322_v4, %v321_v57  ;;  %v326_v12 = vor.u32 %v325_v5, %v324_v61  ;;  %v329_v13 = vor.u32 %v328_v6, %v327_v63  ;;  %vm339_vm5 = vcmp.lt.s32.totalorder %v317_v50, 4 }
  0xaf   : > { %v332_v15 = vor.u32 %v331_v8, %v330_v1  ;;  %v335_v16 = vor.u32 %v334_v10, %v333_v3  ;;  %v425_v24 = vshll.u32 %v942_v56, %v422_v59  ;;  %v426_v27 = vshrl.u32 %v943_v60, %v423_v14 }
  0xb0   : > { %v340_v17 = vsel %vm336_vm2, %v320_v7, %v323_v11  ;;  %v341_v18 = vsel %vm339_vm5, %v329_v13, 2102212464  ;;  %v344_v19 = vsel %vm336_vm2, %v323_v11, %v326_v12  ;;  %v348_v20 = vsel %vm336_vm2, %v326_v12, %v329_v13 }
  0xb1   : > { %v342_v21 = vsel %vm338_vm4, %v326_v12, %v341_v18  ;;  %v345_v22 = vsel %vm339_vm5, %v332_v15, 920167782  ;;  %v349_v23 = vsel %vm339_vm5, %v335_v16, 1326507024  ;;  %v428_v28 = vshll.u32 %v943_v60, %v422_v59 }
  0xb2   : > { %v346_v25 = vsel %vm338_vm4, %v329_v13, %v345_v22  ;;  %v350_v26 = vsel %vm338_vm4, %v332_v15, %v349_v23  ;;  %v343_v29 = vsel %vm337_vm3, %v340_v17, %v342_v21  ;;  %v429_v32 = vshrl.u32 %v944_v62, %v423_v14 }
  0xb3   : > { %v347_v30 = vsel %vm337_vm3, %v344_v19, %v346_v25  ;;  %v351_v31 = vsel %vm337_vm3, %v348_v20, %v350_v26  ;;  %v427_v40 = vor.u32 %v426_v27, %v425_v24  ;;  %v431_v43 = vshll.u32 %v944_v62, %v422_v59 }
  0xb4   : > { %v1025_v33 = vmul.u32.u64.low %v1013_v53, %v351_v31  ;;  %v1026_v37 = vmul.u32.u64.high %v1013_v53, %v351_v31, %v1025_v33  ;;  %v1029_v38 = vmul.u32.u64.low %v1013_v53, %v347_v30  ;;  %v1030_v39 = vmul.u32.u64.high %v1013_v53, %v347_v30, %v1029_v38 }
  0xb5   : > { %v430_v42 = vor.u32 %v429_v32, %v428_v28  ;;  %v432_v44 = vshrl.u32 %v945_v0, %v423_v14  ;;  %v434_v45 = vshll.u32 %v945_v0, %v422_v59  ;;  %v435_v46 = vshrl.u32 %v946_v2, %v423_v14 }
  0xb6   : > { %v438_v47 = vshrl.u32 %v947_v9, %v423_v14  ;;  %v359_v49 = vmul.u32 %v1013_v53, %v343_v29  ;;  %v424_v50 = vshrl.u32 %v942_v56, %v423_v14  ;;  %v437_v52 = vshll.u32 %v946_v2, %v422_v59 }
  0xb7   : > { %v433_v51 = vor.u32 %v432_v44, %v431_v43  ;;  %vm361_vm6 = vc.u32 %v1026_v37, %v1029_v38  ;;  %v362_v55 = vadd.s32 1, %v1030_v39  ;;  %v436_v57 = vor.u32 %v435_v46, %v434_v45 }
  0xb8   : > { %vm440_vm7 = vcmp.lt.s32.totalorder %v1016_v58, 1  ;;  %v439_v60 = vor.u32 %v438_v47, %v437_v52  ;;  %vm442_vm8 = vcmp.lt.s32.totalorder %v1016_v58, 3  ;;  %vm443_vm9 = vcmp.lt.s32.totalorder %v1016_v58, 4 }
  0xb9   : > { %v448_v61 = vsel %vm440_vm7, %v427_v40, %v430_v42  ;;  %v363_v54 = vsel %vm361_vm6, %v362_v55, %v1030_v39  ;;  %v445_v62 = vsel %vm443_vm9, %v433_v51, 2102212464  ;;  %v449_v53 = vsel %vm443_vm9, %v436_v57, 920167782 }
  0xba   : > { %v452_v56 = vsel %vm440_vm7, %v430_v42, %v433_v51  ;;  %v364_v63 = vadd.s32 %v363_v54, %v359_v49  ;;  %vm441_vm10 = vcmp.lt.s32.totalorder %v1016_v58, 2  ;;  %v450_v59 = vsel %vm442_vm8, %v433_v51, %v449_v53 }
  0xbb   : > { %v453_v0 = vsel %vm443_vm9, %v439_v60, 1326507024  ;;  %v444_v1 = vsel %vm440_vm7, %v424_v50, %v427_v40  ;;  %v446_v2 = vsel %vm442_vm8, %v430_v42, %v445_v62  ;;  %v451_v3 = vsel %vm441_vm10, %v448_v61, %v450_v59 }
  0xbc   : > { %v454_v4 = vsel %vm442_vm8, %v436_v57, %v453_v0  ;;  %v365_v5 = vadd.s32 536870912, %v364_v63  ;;  %v1040_v7 = vmul.u32.u64.low %v456_v48, %v451_v3  ;;  %v1041_v8 = vmul.u32.u64.high %v456_v48, %v451_v3, %v1040_v7 }
  0xbd   : > { %v455_v6 = vsel %vm441_vm10, %v452_v56, %v454_v4  ;;  %v447_v12 = vsel %vm441_vm10, %v444_v1, %v446_v2  ;;  %v360_v28 = vadd.s32 %v1029_v38, %v1026_v37  ;;  %vm512_vm2 = vcmask 64512  }
  0xbe   : > { %v1043_v9 = vmul.u32.u64.low %v456_v48, %v455_v6  ;;  %v1044_v10 = vmul.u32.u64.high %v456_v48, %v455_v6, %v1043_v9  ;;  %v366_v11 = vshrl.u32 %v365_v5, 30  ;;  %v466_v14 = vadd.s32 1, %v1041_v8 }
  0xbf   : > { %v463_v58 = vmul.u32 %v456_v48, %v447_v12  ;;  %vm396_vm9 = vweird.f32 %v999_v34 }
  0xc0   : > { %v367_v13 = vshll.u32 %v366_v11, 30  ;;  %vm465_vm11 = vc.u32 %v1044_v10, %v1040_v7  ;;  %v464_v49 = vadd.s32 %v1040_v7, %v1044_v10  ;;  %v390_v60 = vsub.s32 4, %v366_v11 }
  0xc1   : > { %v467_v16 = vsel %vm465_vm11, %v466_v14, %v1041_v8 }
  0xc2   : > { %v368_v15 = vsub.s32 %v364_v63, %v367_v13  ;;  %v468_v17 = vadd.s32 %v467_v16, %v463_v58  ;;  %v391_v63 = vsel %vm306_vm14, %v390_v60, %v366_v11 }
  0xc3   : > { %v393_v2 = vsel %vm305_vm15, 0, %v391_v63 }
  0xc4   : > { %v370_v18 = vsub.s32 0, %v368_v15  ;;  %v469_v19 = vadd.s32 536870912, %v468_v17  ;;  %v397_v5 = vadd.s32 3, %v393_v2  ;;  %v608_v9 = vand.u32 3, %v393_v2 }
  0xc6   : > { %v840_v20 = vmin.u32 %v370_v18, %v368_v15  ;;  %v470_v21 = vshrl.u32 %v469_v19, 30  ;;  %v398_v8 = vand.u32 3, %v397_v5  ;;  %vm610_vm4 = vcmp.eq.s32.totalorder %v608_v9, 0 }
  0xc7   : > { %vm613_vm5 = vcmp.eq.s32.totalorder %v608_v9, 2  ;;  %vm609_vm8 = vcmp.lt.s32.totalorder %v608_v9, 2 }
  0xc8   : > { %v372_v22 = vclz %v840_v20  ;;  %v471_v23 = vshll.u32 %v470_v21, 30  ;;  %v494_v4 = vsub.s32 4, %v470_v21  ;;  %vm403_vm3 = vcmp.eq.s32.totalorder %v398_v8, 2 }
  0xc9   : > { %vm400_vm6 = vcmp.eq.s32.totalorder %v398_v8, 0  ;;  %vm399_vm7 = vcmp.lt.s32.totalorder %v398_v8, 2 }
  0xca   : > { %v841_v24 = vadd.s32 4294967294, %v372_v22  ;;  %v472_v25 = vsub.s32 %v468_v17, %v471_v23  ;;  %v495_v7 = vsel %vm410_vm0, %v494_v4, %v470_v21 }
  0xcb   : > { %v497_v11 = vsel %vm409_vm1, 0, %v495_v7 }
  0xcc   : > { %vm842_vm12 = vcmp.lt.s32.totalorder %v841_v24, 0  ;;  %v474_v27 = vsub.s32 0, %v472_v25  ;;  %v711_v23 = vand.u32 3, %v497_v11 }
  0xcd   : > { %v375_v26 = vsel %vm842_vm12, 0, %v841_v24 }
  0xce   : > { %v376_v29 = vsub.s32 32, %v375_v26  ;;  %v380_v30 = vsub.s32 4294967266, %v375_v26  ;;  %v844_v31 = vmin.u32 %v474_v27, %v472_v25  ;;  %v377_v32 = vshll.u32 %v368_v15, %v375_v26 }
  0xcf   : > { %v501_v15 = vadd.s32 3, %v497_v11  ;;  %vm716_vm11 = vcmp.eq.s32.totalorder %v711_v23, 2 }
  0xd0   : > { %v378_v33 = vshrl.u32 %v360_v28, %v376_v29  ;;  %v381_v39 = vadd.s32 127, %v380_v30  ;;  %v476_v40 = vclz %v844_v31 }
  0xd1   : > { %v502_v22 = vand.u32 3, %v501_v15 }
  0xd2   : > { %v379_v42 = vor.u32 %v378_v33, %v377_v32  ;;  %v382_v43 = vshll.u32 %v381_v39, 23  ;;  %v845_v44 = vadd.s32 4294967294, %v476_v40 }
  0xd3   : > { %vm507_vm10 = vcmp.eq.s32.totalorder %v502_v22, 2  ;;  %vm504_vm12 = vcmp.eq.s32.totalorder %v502_v22, 0 }
  0xd4   : > { %v383_v45 = vor.u32 4788187, %v382_v43  ;;  %vm846_vm13 = vcmp.lt.s32.totalorder %v845_v44, 0  ;;  %v386_v47 = vcvt.s32.f32 %v379_v42 }
  0xd5   : > { %v479_v48 = vsel %vm846_vm13, 0, %v845_v44  ;;  %vm713_vm13 = vcmp.eq.s32.totalorder %v711_v23, 0 }
  0xd6   : > { %v384_v46 = vand.u32 2147483647, %v383_v45  ;;  %v480_v50 = vsub.s32 32, %v479_v48  ;;  %v484_v51 = vsub.s32 4294967266, %v479_v48  ;;  %v481_v38 = vshll.u32 %v472_v25, %v479_v48 }
  0xd8   : > { %v387_v37 = vmul.f32 %v386_v47, %v384_v46  ;;  %v482_v52 = vshrl.u32 %v464_v49, %v480_v50  ;;  %v485_v55 = vadd.s32 127, %v484_v51 }
  0xda   : > { %v388_v57 = vxor.u32 2147483648, %v387_v37  ;;  %v483_v61 = vor.u32 %v482_v52, %v481_v38  ;;  %v486_v54 = vshll.u32 %v485_v55, 23 }
  0xdc   : > { %v389_v62 = vsel %vm306_vm14, %v388_v57, %v387_v37  ;;  %v487_v56 = vor.u32 4788187, %v486_v54  ;;  %v490_v0 = vcvt.s32.f32 %v483_v61  ;;  %vm503_vm14 = vcmp.lt.s32.totalorder %v502_v22, 2 }
  0xdd   : > { %v392_v53 = vsel %vm305_vm15, %v999_v34, %v389_v62  ;;  %vm712_vm15 = vcmp.lt.s32.totalorder %v711_v23, 2 }
  0xde   : > { %907 = vcosq.f32 %v392_v53  ;;  %v488_v59 = vand.u32 2147483647, %v487_v56 }
  0xdf   : > { %909 = vsinq.f32 %v392_v53 }
  0xe0   : > { %v491_v1 = vmul.f32 %v490_v0, %v488_v59 }
  0xe2   : > { %v492_v3 = vxor.u32 2147483648, %v491_v1 }
  0xe4   : > { %v493_v36 = vsel %vm410_vm0, %v492_v3, %v491_v1  ;;  %vm500_vm0 = vweird.f32 %v1001_v35 }
  0xe5   : > { %v496_v6 = vsel %vm409_vm1, %v1001_v35, %v493_v36 }
  0xe6   : > { %911 = vcosq.f32 %v496_v6 }
  0xe7   : > { %913 = vsinq.f32 %v496_v6 }
  0xeb   : > { %v908_v10 = vpop.eup %907 }
  0xec   : > { %v910_v12 = vpop.eup %909  ;;  %v404_v13 = vxor.u32 2147483648, %v908_v10 }
  0xed   : > { %v401_v14 = vxor.u32 2147483648, %v910_v12 }
  0xee   : > { %v405_v41 = vsel %vm403_vm3, %v404_v13, %v910_v12  ;;  %v615_v58 = vsel %vm613_vm5, %v404_v13, %v910_v12 }
  0xef   : > { %v402_v16 = vsel %vm400_vm6, %v908_v10, %v401_v14  ;;  %v612_v17 = vsel %vm610_vm4, %v908_v10, %v401_v14 }
  0xf0   : > { %v406_v18 = vsel %vm399_vm7, %v402_v16, %v405_v41  ;;  %v616_v19 = vsel %vm609_vm8, %v612_v17, %v615_v58 }
  0xf1   : > { %v407_v20 = vsel %vm396_vm9, nan, %v406_v18  ;;  %v617_v21 = vsel %vm396_vm9, nan, %v616_v19 }
  0xf2   : > { %513 = vst.msk [vmem:[%s1063_s30] sm:$0xff] %vm512_vm2, %v407_v20  ;;  %721 = vst.msk [vmem:[%s1063_s30 + $0x10] sm:$0xff] %vm512_vm2, %v617_v21 }
  0xf3   : > { %v912_v24 = vpop.eup %911 }
  0xf4   : > { %v914_v25 = vpop.eup %913  ;;  %v508_v26 = vxor.u32 2147483648, %v912_v24 }
  0xf5   : > { %v505_v27 = vxor.u32 2147483648, %v914_v25 }
  0xf6   : > { %v509_v34 = vsel %vm507_vm10, %v508_v26, %v914_v25  ;;  %v718_v28 = vsel %vm716_vm11, %v508_v26, %v914_v25 }
  0xf7   : > { %v506_v29 = vsel %vm504_vm12, %v912_v24, %v505_v27  ;;  %v715_v30 = vsel %vm713_vm13, %v912_v24, %v505_v27 }
  0xf8   : > { %v510_v31 = vsel %vm503_vm14, %v506_v29, %v509_v34  ;;  %v719_v32 = vsel %vm712_vm15, %v715_v30, %v718_v28 }
  0xf9   : > { %v511_v33 = vsel %vm500_vm0, nan, %v510_v31  ;;  %v720_v39 = vsel %vm500_vm0, nan, %v719_v32 }
  0xfa   : > { %514 = vst.msk [vmem:[%s1063_s30 + $0x8] sm:$0xff] %vm512_vm2, %v511_v33  ;;  %722 = vst.msk [vmem:[%s1063_s30 + $0x18] sm:$0xff] %vm512_vm2, %v720_v39 }
  0xfb PF: > { %s13_s14 = sadd.s32 1, %s937_s14   ;;  %s1088_s12 = smov %s933_s13 }
  0xfc   : > { %p10_p5 = scmp.ge.s32.totalorder %s13_s14, 4   ;;  %s1089_s13 = smov %s1091_s15 }
  0xfe   :  { %12 = sbr.rel (!%p10_p5) target bundleno = 2 (0x2), region = 68 }

</bundles_post_ra>
